<compile_context>
chip_gen: v5e
topology: v5e:2x2
jax: 0.10.0
libtpu: 0.0.40
codegen_flags: <defaults>
</compile_context>

<pallas_src>
import jax
import jax.numpy as jnp
from jax.experimental import pallas as pl
from jax.experimental.pallas import tpu as pltpu


def summer_kernel(x_ref, w1_ref, b1_ref, w2_ref, out_ref):
    # x_ref:  (Bt, N, din_p)   w1_ref: (din_p, dh)   b1_ref: (1, dh)
    # w2_ref: (1, dh)          out_ref: (Bt, din_p)
    bt, n, din_p = x_ref.shape
    x = x_ref[...]                                  # (Bt, N, din_p)

    # Fused hidden matmul on the MXU: (Bt*N, din_p) @ (din_p, dh), f32 acc.
    x2 = x.reshape(bt * n, din_p)
    h = jnp.tanh(
        jnp.dot(x2, w1_ref[...], preferred_element_type=jnp.float32)
        + b1_ref[...]
    )                                               # (Bt*N, dh)

    # Logits on the VPU/XLU: multiply by w2 and reduce over the dh lanes.
    # (b2 omitted: softmax is shift-invariant.)
    logits = jnp.sum(h * w2_ref[...], axis=-1, keepdims=True)  # (Bt*N, 1)
    logits = logits.reshape(bt, n, 1)                          # (Bt, N, 1)

    # Softmax over the N axis (sublane reduces), numerically stabilized.
    m = jnp.max(logits, axis=1, keepdims=True)      # (Bt, 1, 1)
    e = jnp.exp(logits - m)                         # (Bt, N, 1)
    s = e / jnp.sum(e, axis=1, keepdims=True)       # (Bt, N, 1)

    # Weighted sum over N: broadcast multiply + sublane reduce.
    out_ref[...] = jnp.sum(s * x, axis=1)           # (Bt, din_p)


def summer_forward(x, w1, b1, w2, *, bt=None):
    """x: (B, N, din) or (N, din) float32. Returns (B, din) or (din,)."""
    squeeze = x.ndim == 2
    if squeeze:
        x = x[None]
    B, N, din = x.shape
    dh = w1.shape[1]

    # Pad din to a multiple of 128 so x blocks and output stores are
    # lane-dense. Zero-padding x columns and matching W1 rows leaves the math
    # unchanged; slice the result back afterwards.
    din_p = ((din + 127) // 128) * 128
    if din_p != din:
        x = jnp.pad(x, ((0, 0), (0, 0), (0, din_p - din)))
        w1 = jnp.pad(w1, ((0, din_p - din), (0, 0)))

    # Choose the batch tile: ~4 MiB x-block budget (double-buffered ~8 MiB),
    # safe under v5e's 16 MiB default scoped VMEM and v7x's 64 MiB physical.
    if bt is None:
        bytes_per_tracker = N * din_p * 4
        bt = max(1, (4 << 20) // max(bytes_per_tracker, 1))
    bt = min(bt, B)
    bt = ((bt + 7) // 8) * 8          # multiple of 8 -> sublane-dense output

    # Pad the batch so it divides evenly into Bt-sized blocks. Padded
    # (all-zero) trackers are independent and sliced away afterwards.
    B_p = pl.cdiv(B, bt) * bt
    if B_p != B:
        x = jnp.pad(x, ((0, B_p - B), (0, 0), (0, 0)))

    out = pl.pallas_call(
        summer_kernel,
        out_shape=jax.ShapeDtypeStruct((B_p, din_p), jnp.float32),
        grid=(B_p // bt,),
        in_specs=[
            pl.BlockSpec((bt, N, din_p), lambda b: (b, 0, 0)),   # x
            pl.BlockSpec((din_p, dh), lambda b: (0, 0)),         # W1
            pl.BlockSpec((1, dh), lambda b: (0, 0)),             # b1
            pl.BlockSpec((1, dh), lambda b: (0, 0)),             # W2
        ],
        out_specs=pl.BlockSpec((bt, din_p), lambda b: (b, 0)),
        compiler_params=pltpu.CompilerParams(
            dimension_semantics=("parallel",),
            vmem_limit_bytes=32 << 20,
        ),
    )(x, w1, b1, w2)

    out = out[:B, :din]
    return out[0] if squeeze else out


def init_params(key, din, dh):
    """Deterministic init mimicking nn.Linear's uniform(-1/sqrt(fan_in), ...)"""
    k1, k2, k3, k4 = jax.random.split(key, 4)
    bound1 = 1.0 / jnp.sqrt(din)
    bound2 = 1.0 / jnp.sqrt(dh)
    w1 = jax.random.uniform(k1, (din, dh), jnp.float32, -bound1, bound1)
    b1 = jax.random.uniform(k2, (1, dh), jnp.float32, -bound1, bound1)
    w2 = jax.random.uniform(k3, (1, dh), jnp.float32, -bound2, bound2)
    b2 = jax.random.uniform(k4, (1, 1), jnp.float32, -bound2, bound2)
    return w1, b1, w2, b2


def summer_reference(x, w1, b1, w2, b2):
    """Pure-JAX reference for one (N, din) instance (keeps b2 to check
    that dropping it in the kernel is indeed a no-op)."""
    h = jnp.tanh(x @ w1 + b1)
    logits = jnp.sum(h * w2, axis=1, keepdims=True) + b2[0, 0]
    s = jax.nn.softmax(logits, axis=0)
    return jnp.sum(s * x, axis=0)


if __name__ == "__main__":
    B, N, DIN, DH = 16, 8, 32, 16  # 16 trackers, seq=8, input=32, hidden=16

    key = jax.random.PRNGKey(0)
    kx, kp = jax.random.split(key)
    x = jax.random.normal(kx, (B, N, DIN), jnp.float32)
    w1, b1, w2, b2 = init_params(kp, DIN, DH)

    # Batched path (batch-blocked grid).
    out = summer_forward(x, w1, b1, w2)
    jax.block_until_ready(out)
    ref = jax.vmap(lambda xb: summer_reference(xb, w1, b1, w2, b2))(x)
    assert out.shape == (B, DIN)
    assert jnp.allclose(out, ref, atol=1e-5, rtol=1e-5)

    # Single-instance path (matches the PyTorch module's (N, din) input).
    out1 = summer_forward(x[0], w1, b1, w2)
    jax.block_until_ready(out1)
    assert out1.shape == (DIN,)
    assert jnp.allclose(out1, summer_reference(x[0], w1, b1, w2, b2),
                        atol=1e-5, rtol=1e-5)

    print("KERNEL_OK")
</pallas_src>

<mosaic_0001>
module attributes {stable_mosaic.version = 11 : i64} {
  func.func @summer_kernel(%arg0: i32, %arg1: memref<16x8x128xf32, #tpu.memory_space<vmem>>, %arg2: memref<128x16xf32, #tpu.memory_space<vmem>>, %arg3: memref<1x16xf32, #tpu.memory_space<vmem>>, %arg4: memref<1x16xf32, #tpu.memory_space<vmem>>, %arg5: memref<16x128xf32, #tpu.memory_space<vmem>>) attributes {dimension_semantics = [#tpu.dimension_semantics<parallel>], iteration_bounds = array<i64: 1>, scalar_prefetch = 0 : i64, scratch_operands = 0 : i64, tpu.core_type = #tpu.core_type<tc>, window_params = [{transform_indices = @transform_0, window_bounds = array<i64: 16, 8, 128>}, {pipeline_mode = #tpu.pipeline_mode<synchronous>, transform_indices = @transform_1, window_bounds = array<i64: 128, 16>}, {pipeline_mode = #tpu.pipeline_mode<synchronous>, transform_indices = @transform_2, window_bounds = array<i64: 1, 16>}, {pipeline_mode = #tpu.pipeline_mode<synchronous>, transform_indices = @transform_3, window_bounds = array<i64: 1, 16>}, {transform_indices = @transform_4, window_bounds = array<i64: 16, 128>}]} {
    %c0 = arith.constant 0 : index
    %c0_0 = arith.constant 0 : index
    %c0_1 = arith.constant 0 : index
    %0 = vector.load %arg1[%c0, %c0_0, %c0_1] : memref<16x8x128xf32, #tpu.memory_space<vmem>>, vector<16x8x128xf32>
    %1 = vector.shape_cast %0 : vector<16x8x128xf32> to vector<128x128xf32>
    %c0_2 = arith.constant 0 : index
    %c0_3 = arith.constant 0 : index
    %2 = vector.load %arg2[%c0_2, %c0_3] : memref<128x16xf32, #tpu.memory_space<vmem>>, vector<128x16xf32>
    %cst = arith.constant dense<0.000000e+00> : vector<128x16xf32>
    %3 = tpu.matmul %1, %2, %cst {dimension_numbers = #tpu.dot_dimension_numbers<[1], [0], [0], [1], [0, 0, 1, 1], [], []>} : vector<128x128xf32>, vector<128x16xf32>, vector<128x16xf32> -> vector<128x16xf32>
    %c0_4 = arith.constant 0 : index
    %c0_5 = arith.constant 0 : index
    %4 = vector.load %arg3[%c0_4, %c0_5] : memref<1x16xf32, #tpu.memory_space<vmem>>, vector<1x16xf32>
    %5 = vector.broadcast %4 : vector<1x16xf32> to vector<128x16xf32>
    %6 = arith.addf %3, %5 : vector<128x16xf32>
    %7 = math.tanh %6 : vector<128x16xf32>
    %c0_6 = arith.constant 0 : index
    %c0_7 = arith.constant 0 : index
    %8 = vector.load %arg4[%c0_6, %c0_7] : memref<1x16xf32, #tpu.memory_space<vmem>>, vector<1x16xf32>
    %9 = vector.broadcast %8 : vector<1x16xf32> to vector<128x16xf32>
    %10 = arith.mulf %7, %9 : vector<128x16xf32>
    %cst_8 = arith.constant dense<0.000000e+00> : vector<128xf32>
    %11 = vector.multi_reduction <add>, %10, %cst_8 [1] : vector<128x16xf32> to vector<128xf32>
    %12 = vector.shape_cast %11 : vector<128xf32> to vector<128x1xf32>
    %13 = vector.shape_cast %12 : vector<128x1xf32> to vector<16x8x1xf32>
    %cst_9 = arith.constant dense<0xFF800000> : vector<16x1xf32>
    %14 = vector.multi_reduction <maximumf>, %13, %cst_9 [1] : vector<16x8x1xf32> to vector<16x1xf32>
    %15 = vector.shape_cast %14 : vector<16x1xf32> to vector<16x1x1xf32>
    %16 = vector.broadcast %15 : vector<16x1x1xf32> to vector<16x8x1xf32>
    %17 = arith.subf %13, %16 : vector<16x8x1xf32>
    %18 = math.exp %17 : vector<16x8x1xf32>
    %cst_10 = arith.constant dense<0.000000e+00> : vector<16x1xf32>
    %19 = vector.multi_reduction <add>, %18, %cst_10 [1] : vector<16x8x1xf32> to vector<16x1xf32>
    %20 = vector.shape_cast %19 : vector<16x1xf32> to vector<16x1x1xf32>
    %21 = vector.broadcast %20 : vector<16x1x1xf32> to vector<16x8x1xf32>
    %22 = arith.divf %18, %21 : vector<16x8x1xf32>
    %23 = vector.broadcast %22 : vector<16x8x1xf32> to vector<16x8x128xf32>
    %24 = arith.mulf %23, %0 : vector<16x8x128xf32>
    %cst_11 = arith.constant dense<0.000000e+00> : vector<16x128xf32>
    %25 = vector.multi_reduction <add>, %24, %cst_11 [1] : vector<16x8x128xf32> to vector<16x128xf32>
    %c0_12 = arith.constant 0 : index
    %c0_13 = arith.constant 0 : index
    %26 = vector.load %arg5[%c0_12, %c0_13] : memref<16x128xf32, #tpu.memory_space<vmem>>, vector<16x128xf32>
    tpu.vector_store %arg5[%c0_12, %c0_13], %25 {strides = array<i32>} : memref<16x128xf32, #tpu.memory_space<vmem>>, vector<16x128xf32>,
    return
  }
  func.func @transform_0(%arg0: i32) -> (i32, i32, i32) {
    %c0_i32 = arith.constant 0 : i32
    %c0_i32_0 = arith.constant 0 : i32
    %c0_i32_1 = arith.constant 0 : i32
    return %arg0, %c0_i32, %c0_i32_0 : i32, i32, i32
  }
  func.func @transform_1(%arg0: i32) -> (i32, i32) {
    %c0_i32 = arith.constant 0 : i32
    %c0_i32_0 = arith.constant 0 : i32
    %c0_i32_1 = arith.constant 0 : i32
    return %c0_i32, %c0_i32_0 : i32, i32
  }
  func.func @transform_2(%arg0: i32) -> (i32, i32) {
    %c0_i32 = arith.constant 0 : i32
    %c0_i32_0 = arith.constant 0 : i32
    %c0_i32_1 = arith.constant 0 : i32
    return %c0_i32, %c0_i32_0 : i32, i32
  }
  func.func @transform_3(%arg0: i32) -> (i32, i32) {
    %c0_i32 = arith.constant 0 : i32
    %c0_i32_0 = arith.constant 0 : i32
    %c0_i32_1 = arith.constant 0 : i32
    return %c0_i32, %c0_i32_0 : i32, i32
  }
  func.func @transform_4(%arg0: i32) -> (i32, i32) {
    %c0_i32 = arith.constant 0 : i32
    %c0_i32_0 = arith.constant 0 : i32
    return %arg0, %c0_i32 : i32, i32
  }
}

</mosaic_0001>

<bundles_post_ra>
// kernel: tpu_custom_call.1
= control target key start
LH: loop header
LB: loop body
LE: loop exit
PB: predicated region body
PF: predicated region fallthrough
CT: control target
= control target key end

     0   :  { %s1781_s0 = inlined_call_operand.vmem [shape: f32[16,8,128], index: 0, kind: input, shape index: {}]   ;;  %s1782_s1 = inlined_call_operand.vmem [shape: f32[128,16], index: 1, kind: input, shape index: {}]   ;;  %s1783_s2 = inlined_call_operand.vmem [shape: f32[1,16], index: 2, kind: input, shape index: {}]   ;;  %s1784_s3 = inlined_call_operand.vmem [shape: f32[1,16], index: 3, kind: input, shape index: {}]   ;;  %s1785_s4 = inlined_call_operand.hbm [shape: f32[16,128], index: 4, kind: output, shape index: {}]  }
   0x1   :  { %v49_v0 = vld [vmem:[%s1782_s1 + $0x78] sm:$0xff]  ;;  %v48_v1 = vld [vmem:[%s1782_s1 + $0x70] sm:$0xff]  ;;  %v47_v2 = vld [vmem:[%s1782_s1 + $0x68] sm:$0xff] }
   0x2   :  { %54 = vmatpush.msra.mxu0 %v49_v0  ;;  %855 = vmatpush.msra.mxu1 %v49_v0  ;;  %v46_v3 = vld [vmem:[%s1782_s1 + $0x60] sm:$0xff]  ;;  %v45_v4 = vld [vmem:[%s1782_s1 + $0x58] sm:$0xff] }
   0x3   :  { %856 = vmatpush.msra.mxu2 %v49_v0  ;;  %857 = vmatpush.msra.mxu3 %v49_v0 }
   0x4   :  { %55 = vmatpush.msra.mxu0 %v48_v1  ;;  %858 = vmatpush.msra.mxu1 %v48_v1 }
   0x5   :  { %859 = vmatpush.msra.mxu2 %v48_v1  ;;  %860 = vmatpush.msra.mxu3 %v48_v1 }
   0x6   :  { %56 = vmatpush.msra.mxu0 %v47_v2  ;;  %861 = vmatpush.msra.mxu1 %v47_v2 }
   0x7   :  { %862 = vmatpush.msra.mxu2 %v47_v2  ;;  %863 = vmatpush.msra.mxu3 %v47_v2 }
   0x8   :  { %57 = vmatpush.msra.mxu0 %v46_v3  ;;  %864 = vmatpush.msra.mxu1 %v46_v3 }
   0x9   :  { %9 = vsyncpa [#allocation3], 0  ;;  %865 = vmatpush.msra.mxu2 %v46_v3  ;;  %866 = vmatpush.msra.mxu3 %v46_v3  ;;  %v44_v5 = vld [vmem:[%s1782_s1 + $0x50] sm:$0xff]  ;;  %v43_v6 = vld [vmem:[%s1782_s1 + $0x48] sm:$0xff]  ;;  %vm155_vm0 = vcmask 130048   ;;  %s843_s27 = sshll.u32 %s1785_s4, 4  ;;  %s844_s27 = int_to_ptr.hbm [resolvable:$true] %s843_s27 }
   0xa   :  { %58 = vmatpush.msra.mxu0 %v45_v4  ;;  %867 = vmatpush.msra.mxu1 %v45_v4  ;;  %v42_v7 = vld [vmem:[%s1782_s1 + $0x40] sm:$0xff]  ;;  %v41_v8 = vld [vmem:[%s1782_s1 + $0x38] sm:$0xff]  ;;  %v40_v9 = vld [vmem:[%s1782_s1 + $0x30] sm:$0xff]  ;;  %s1043_s28 = smov 128  }
   0xb   :  { %868 = vmatpush.msra.mxu2 %v45_v4  ;;  %869 = vmatpush.msra.mxu3 %v45_v4  ;;  %v39_v10 = vld [vmem:[%s1782_s1 + $0x28] sm:$0xff]  ;;  %v38_v11 = vld [vmem:[%s1782_s1 + $0x20] sm:$0xff]  ;;  %v37_v12 = vld [vmem:[%s1782_s1 + $0x18] sm:$0xff] }
   0xc   :  { %59 = vmatpush.msra.mxu0 %v44_v5  ;;  %870 = vmatpush.msra.mxu1 %v44_v5  ;;  %v36_v13 = vld [vmem:[%s1782_s1 + $0x10] sm:$0xff]  ;;  %v35_v14 = vld [vmem:[%s1782_s1 + $0x8] sm:$0xff]  ;;  %v34_v15 = vld [vmem:[%s1782_s1] sm:$0xff] }
   0xd   :  { %871 = vmatpush.msra.mxu2 %v44_v5  ;;  %872 = vmatpush.msra.mxu3 %v44_v5  ;;  %v1121_v16 = vld [vmem:[%s1781_s0] sm:$0xff]  ;;  %v19_v20 = vld [vmem:[%s1781_s0 + $0x8] sm:$0xff]  ;;  %v20_v24 = vld [vmem:[%s1781_s0 + $0x10] sm:$0xff] }
   0xe   :  { %60 = vmatpush.msra.mxu0 %v43_v6  ;;  %873 = vmatpush.msra.mxu1 %v43_v6  ;;  %v1126_v17 = vld [vmem:[%s1781_s0 + $0x20] sm:$0xff]  ;;  %v23_v21 = vld [vmem:[%s1781_s0 + $0x28] sm:$0xff]  ;;  %v24_v25 = vld [vmem:[%s1781_s0 + $0x30] sm:$0xff] }
   0xf   :  { %874 = vmatpush.msra.mxu2 %v43_v6  ;;  %875 = vmatpush.msra.mxu3 %v43_v6  ;;  %v1131_v18 = vld [vmem:[%s1781_s0 + $0x40] sm:$0xff]  ;;  %v27_v22 = vld [vmem:[%s1781_s0 + $0x48] sm:$0xff]  ;;  %v28_v26 = vld [vmem:[%s1781_s0 + $0x50] sm:$0xff] }
  0x10   :  { %61 = vmatpush.msra.mxu0 %v42_v7  ;;  %876 = vmatpush.msra.mxu1 %v42_v7  ;;  %v1136_v19 = vld [vmem:[%s1781_s0 + $0x60] sm:$0xff]  ;;  %v31_v23 = vld [vmem:[%s1781_s0 + $0x68] sm:$0xff]  ;;  %v32_v27 = vld [vmem:[%s1781_s0 + $0x70] sm:$0xff] }
  0x11   :  { %877 = vmatpush.msra.mxu2 %v42_v7  ;;  %878 = vmatpush.msra.mxu3 %v42_v7  ;;  %v21_v28 = vld [vmem:[%s1781_s0 + $0x18] sm:$0xff]  ;;  %v1181_v32 = vld [vmem:[%s1783_s2] ss:$0 sm:$0xff]  ;;  %s1044_s2 = smov 8  }
  0x12   :  { %62 = vmatpush.msra.mxu0 %v41_v8  ;;  %879 = vmatpush.msra.mxu1 %v41_v8  ;;  %v25_v29 = vld [vmem:[%s1781_s0 + $0x38] sm:$0xff]  ;;  %v1188_v37 = vld [vmem:[%s1784_s3] ss:$0 sm:$0xff] }
  0x13   :  { %880 = vmatpush.msra.mxu2 %v41_v8  ;;  %881 = vmatpush.msra.mxu3 %v41_v8  ;;  %v29_v30 = vld [vmem:[%s1781_s0 + $0x58] sm:$0xff] }
  0x14   :  { %63 = vmatpush.msra.mxu0 %v40_v9  ;;  %882 = vmatpush.msra.mxu1 %v40_v9  ;;  %v33_v31 = vld [vmem:[%s1781_s0 + $0x78] sm:$0xff] }
  0x15   :  { %883 = vmatpush.msra.mxu2 %v40_v9  ;;  %884 = vmatpush.msra.mxu3 %v40_v9 }
  0x16   :  { %64 = vmatpush.msra.mxu0 %v39_v10  ;;  %885 = vmatpush.msra.mxu1 %v39_v10 }
  0x17   :  { %886 = vmatpush.msra.mxu2 %v39_v10  ;;  %887 = vmatpush.msra.mxu3 %v39_v10 }
  0x18   :  { %65 = vmatpush.msra.mxu0 %v38_v11  ;;  %888 = vmatpush.msra.mxu1 %v38_v11 }
  0x19   :  { %889 = vmatpush.msra.mxu2 %v38_v11  ;;  %890 = vmatpush.msra.mxu3 %v38_v11 }
  0x1a   :  { %66 = vmatpush.msra.mxu0 %v37_v12  ;;  %891 = vmatpush.msra.mxu1 %v37_v12 }
  0x1b   :  { %892 = vmatpush.msra.mxu2 %v37_v12  ;;  %893 = vmatpush.msra.mxu3 %v37_v12 }
  0x1c   :  { %67 = vmatpush.msra.mxu0 %v36_v13  ;;  %894 = vmatpush.msra.mxu1 %v36_v13 }
  0x1d   :  { %895 = vmatpush.msra.mxu2 %v36_v13  ;;  %896 = vmatpush.msra.mxu3 %v36_v13 }
  0x1e   :  { %68 = vmatpush.msra.mxu0 %v35_v14  ;;  %897 = vmatpush.msra.mxu1 %v35_v14 }
  0x1f   :  { %898 = vmatpush.msra.mxu2 %v35_v14  ;;  %899 = vmatpush.msra.mxu3 %v35_v14 }
  0x20   :  { %69 = vmatpush.msra.mxu0 %v34_v15  ;;  %900 = vmatpush.msra.mxu1 %v34_v15 }
  0x21   :  { %901 = vmatpush.msra.mxu2 %v34_v15  ;;  %902 = vmatpush.msra.mxu3 %v34_v15 }
  0x22   :  { %70 = vmatmul.f32.vlgmr.msra.gmra.mxu0 %v1121_v16  ;;  %82 = vmatmul.f32.vlgmr.msra.gmra.mxu1 %v1126_v17 }
  0x23   :  { %94 = vmatmul.f32.vlgmr.msra.gmra.mxu2 %v1131_v18  ;;  %106 = vmatmul.f32.vlgmr.msra.gmra.mxu3 %v1136_v19 }
  0x2a   :  { %73 = vmatmul.f32.gmra.mxu0 %v19_v20  ;;  %85 = vmatmul.f32.gmra.mxu1 %v23_v21 }
  0x2b   :  { %97 = vmatmul.f32.gmra.mxu2 %v27_v22  ;;  %109 = vmatmul.f32.gmra.mxu3 %v31_v23 }
  0x32   :  { %76 = vmatmul.f32.gmra.mxu0 %v20_v24  ;;  %88 = vmatmul.f32.gmra.mxu1 %v24_v25 }
  0x33   :  { %100 = vmatmul.f32.gmra.mxu2 %v28_v26  ;;  %112 = vmatmul.f32.gmra.mxu3 %v32_v27 }
  0x3a   :  { %79 = vmatmul.f32.gmra.mxu0 %v21_v28  ;;  %91 = vmatmul.f32.gmra.mxu1 %v25_v29 }
  0x3b   :  { %103 = vmatmul.f32.gmra.mxu2 %v29_v30  ;;  %115 = vmatmul.f32.gmra.mxu3 %v33_v31 }
  0x9f   :  { %v71_v33 = vpop.f32.mrf.mxu0  ;;  %v83_v34 = vpop.f32.mrf.mxu1 }
  0xa0   :  { %v72_v35 = vadd.f32 %v1181_v32, %v71_v33  ;;  %v84_v36 = vadd.f32 %v1181_v32, %v83_v34 }
  0xa2   :  { %908 = vtanh.f32 %v72_v35 }
  0xa3   :  { %910 = vtanh.f32 %v84_v36 }
  0xa6   :  { %v95_v38 = vpop.f32.mrf.mxu2  ;;  %v107_v39 = vpop.f32.mrf.mxu3 }
  0xa7   :  { %v96_v40 = vadd.f32 %v1181_v32, %v95_v38  ;;  %v108_v41 = vadd.f32 %v1181_v32, %v107_v39  ;;  %v74_v42 = vpop.f32.mrf.mxu0  ;;  %v86_v43 = vpop.f32.mrf.mxu1 }
  0xa8   :  { %v909_v44 = vpop.eup %908  ;;  %v75_v45 = vadd.f32 %v1181_v32, %v74_v42  ;;  %v87_v46 = vadd.f32 %v1181_v32, %v86_v43 }
  0xa9   :  { %v911_v47 = vpop.eup %910  ;;  %912 = vtanh.f32 %v96_v40  ;;  %v139_v48 = vmul.f32 %v909_v44, %v1188_v37 }
  0xaa   :  { %914 = vtanh.f32 %v108_v41  ;;  %v143_v49 = vmul.f32 %v911_v47, %v1188_v37 }
  0xab   :  { %v156_v50 = vsel %vm155_vm0, %v139_v48, 0.0  ;;  %916 = vtanh.f32 %v75_v45 }
  0xac   :  { %v168_v51 = vsel %vm155_vm0, %v143_v49, 0.0  ;;  %157 = vadd.xlane.f32.xlu0 %v156_v50  ;;  %918 = vtanh.f32 %v87_v46 }
  0xad   :  { %169 = vadd.xlane.f32.xlu2 %v168_v51 }
  0xae   :  { %v98_v52 = vpop.f32.mrf.mxu2  ;;  %v110_v53 = vpop.f32.mrf.mxu3 }
  0xaf   :  { %v913_v54 = vpop.eup %912  ;;  %v111_v55 = vadd.f32 %v1181_v32, %v110_v53  ;;  %v77_v56 = vpop.f32.mrf.mxu0  ;;  %v99_v63 = vadd.f32 %v1181_v32, %v98_v52 }
  0xb0   :  { %v89_v57 = vpop.f32.mrf.mxu1  ;;  %v915_v58 = vpop.eup %914  ;;  %v147_v59 = vmul.f32 %v913_v54, %v1188_v37  ;;  %v78_v60 = vadd.f32 %v1181_v32, %v77_v56 }
  0xb1   :  { %v90_v61 = vadd.f32 %v1181_v32, %v89_v57  ;;  %v917_v62 = vpop.eup %916  ;;  %v151_v0 = vmul.f32 %v915_v58, %v1188_v37  ;;  %920 = vtanh.f32 %v111_v55 }
  0xb2   :  { %v919_v1 = vpop.eup %918  ;;  %v180_v2 = vsel %vm155_vm0, %v147_v59, 0.0  ;;  %922 = vtanh.f32 %v78_v60  ;;  %v140_v5 = vmul.f32 %v917_v62, %v1188_v37 }
  0xb3   :  { %181 = vadd.xlane.f32.xlu1 %v180_v2  ;;  %v192_v3 = vsel %vm155_vm0, %v151_v0, 0.0  ;;  %924 = vtanh.f32 %v90_v61  ;;  %v144_v4 = vmul.f32 %v919_v1, %v1188_v37 }
  0xb4   :  { %193 = vadd.xlane.f32.xlu0 %v192_v3  ;;  %926 = vtanh.f32 %v99_v63  ;;  %v159_v14 = vsel %vm155_vm0, %v140_v5, 0.0 }
  0xb5   :  { %v171_v10 = vsel %vm155_vm0, %v144_v4, 0.0 }
  0xb6   :  { %v101_v6 = vpop.f32.mrf.mxu2  ;;  %v113_v7 = vpop.f32.mrf.mxu3 }
  0xb7   :  { %v80_v8 = vpop.f32.mrf.mxu0  ;;  %v921_v9 = vpop.eup %920  ;;  %v102_v20 = vadd.f32 %v1181_v32, %v101_v6  ;;  %v114_v33 = vadd.f32 %v1181_v32, %v113_v7 }
  0xb8   :  { %v81_v11 = vadd.f32 %v1181_v32, %v80_v8  ;;  %v923_v12 = vpop.eup %922  ;;  %v152_v13 = vmul.f32 %v921_v9, %v1188_v37  ;;  %v92_v23 = vpop.f32.mrf.mxu1 }
  0xb9   :  { %v925_v15 = vpop.eup %924  ;;  %v141_v24 = vmul.f32 %v923_v12, %v1188_v37  ;;  %v93_v30 = vadd.f32 %v1181_v32, %v92_v23 }
  0xba   :  { %v927_v21 = vpop.eup %926  ;;  %v195_v22 = vsel %vm155_vm0, %v152_v13, 0.0  ;;  %928 = vtanh.f32 %v81_v11  ;;  %v145_v25 = vmul.f32 %v925_v15, %v1188_v37 }
  0xbb   :  { %172 = vadd.xlane.f32.xlu1 %v171_v10  ;;  %196 = vadd.xlane.f32.xlu2 %v195_v22  ;;  %930 = vtanh.f32 %v102_v20  ;;  %v148_v27 = vmul.f32 %v927_v21, %v1188_v37  ;;  %v162_v34 = vsel %vm155_vm0, %v141_v24, 0.0 }
  0xbc   :  { %160 = vadd.xlane.f32.xlu0 %v159_v14  ;;  %v174_v35 = vsel %vm155_vm0, %v145_v25, 0.0 }
  0xbd   :  { %v183_v38 = vsel %vm155_vm0, %v148_v27, 0.0 }
  0xbe   :  { %v104_v26 = vpop.f32.mrf.mxu2  ;;  %v116_v28 = vpop.f32.mrf.mxu3 }
  0xbf   :  { %v105_v29 = vadd.f32 %v1181_v32, %v104_v26  ;;  %v117_v31 = vadd.f32 %v1181_v32, %v116_v28 }
  0xc0   :  { %v929_v36 = vpop.eup %928 }
  0xc1   :  { %932 = vtanh.f32 %v105_v29  ;;  %v931_v39 = vpop.eup %930  ;;  %v142_v40 = vmul.f32 %v929_v36, %v1188_v37 }
  0xc2   :  { %934 = vtanh.f32 %v93_v30  ;;  %v149_v42 = vmul.f32 %v931_v39, %v1188_v37 }
  0xc3   :  { %184 = vadd.xlane.f32.xlu1 %v183_v38  ;;  %163 = vadd.xlane.f32.xlu2 %v162_v34  ;;  %936 = vtanh.f32 %v117_v31  ;;  %v165_v44 = vsel %vm155_vm0, %v142_v40, 0.0 }
  0xc4   :  { %175 = vadd.xlane.f32.xlu0 %v174_v35  ;;  %938 = vtanh.f32 %v114_v33  ;;  %v186_v48 = vsel %vm155_vm0, %v149_v42, 0.0 }
  0xc7   :  { %v933_v41 = vpop.eup %932 }
  0xc8   :  { %v150_v32 = vmul.f32 %v933_v41, %v1188_v37  ;;  %v935_v43 = vpop.eup %934 }
  0xc9   :  { %v937_v45 = vpop.eup %936  ;;  %v146_v49 = vmul.f32 %v935_v43, %v1188_v37 }
  0xca   :  { %v189_v46 = vsel %vm155_vm0, %v150_v32, 0.0  ;;  %v939_v47 = vpop.eup %938  ;;  %v154_v50 = vmul.f32 %v937_v45, %v1188_v37 }
  0xcb   :  { %190 = vadd.xlane.f32.xlu1 %v189_v46  ;;  %187 = vadd.xlane.f32.xlu2 %v186_v48  ;;  %v153_v51 = vmul.f32 %v939_v47, %v1188_v37  ;;  %v177_v52 = vsel %vm155_vm0, %v146_v49, 0.0 }
  0xcc   :  { %166 = vadd.xlane.f32.xlu0 %v165_v44  ;;  %v201_v53 = vsel %vm155_vm0, %v154_v50, 0.0 }
  0xcd   :  { %v198_v54 = vsel %vm155_vm0, %v153_v51, 0.0 }
  0xd3   :  { %199 = vadd.xlane.f32.xlu1 %v198_v54  ;;  %178 = vadd.xlane.f32.xlu2 %v177_v52 }
  0xd4   :  { %202 = vadd.xlane.f32.xlu0 %v201_v53 }
 0x11f   :  { %v158_v55 = vpop.xlane.xlu0 %157 }
 0x120   :  { %v170_v56 = vpop.xlane.xlu2 %169  ;;  %v204_v57 = vrot.slane %v158_v55, 4 }
 0x121   :  { %v228_v58 = vrot.slane %v170_v56, 4 }
 0x122   :  { %v205_v59 = vmax.f32 %v158_v55, %v204_v57 }
 0x123   :  { %v229_v60 = vmax.f32 %v170_v56, %v228_v58 }
 0x124   :  { %v206_v61 = vrot.slane %v205_v59, 2 }
 0x125   :  { %v230_v62 = vrot.slane %v229_v60, 2 }
 0x126   :  { %v207_v63 = vmax.f32 %v205_v59, %v206_v61  ;;  %v182_v0 = vpop.xlane.xlu1 %181 }
 0x127   :  { %v231_v37 = vmax.f32 %v229_v60, %v230_v62  ;;  %v252_v1 = vrot.slane %v182_v0, 4  ;;  %v194_v2 = vpop.xlane.xlu0 %193 }
 0x128   :  { %v208_v3 = vrot.slane %v207_v63, 1  ;;  %v276_v4 = vrot.slane %v194_v2, 4 }
 0x129   :  { %v232_v5 = vrot.slane %v231_v37, 1  ;;  %v253_v6 = vmax.f32 %v182_v0, %v252_v1 }
 0x12a   :  { %v209_v7 = vmax.f32 %v207_v63, %v208_v3  ;;  %v277_v8 = vmax.f32 %v194_v2, %v276_v4 }
 0x12b   :  { %v233_v9 = vmax.f32 %v231_v37, %v232_v5  ;;  %v254_v10 = vrot.slane %v253_v6, 2 }
 0x12c   :  { %v300_v11 = vsub.f32 %v158_v55, %v209_v7  ;;  %v278_v12 = vrot.slane %v277_v8, 2 }
 0x12d   :  { %v304_v13 = vsub.f32 %v170_v56, %v233_v9  ;;  %v255_v14 = vmax.f32 %v253_v6, %v254_v10 }
 0x12e   :  { %v316_v15 = vmul.f32 1.442695, %v300_v11  ;;  %v279_v20 = vmax.f32 %v277_v8, %v278_v12  ;;  %v173_v21 = vpop.xlane.xlu1 %172  ;;  %v1236_v25 = vpop.xlane.xlu2 %196 }
 0x12f   :  { %v324_v22 = vmul.f32 1.442695, %v304_v13  ;;  %v256_v23 = vrot.slane %v255_v14, 1  ;;  %v234_v24 = vrot.slane %v173_v21, 4  ;;  %v161_v26 = vpop.xlane.xlu0 %160  ;;  %v282_v28 = vrot.slane %v1236_v25, 4 }
 0x130   :  { %940 = vpow2.f32 %v316_v15  ;;  %v280_v27 = vrot.slane %v279_v20, 1  ;;  %v210_v29 = vrot.slane %v161_v26, 4 }
 0x131   :  { %942 = vpow2.f32 %v324_v22  ;;  %v257_v30 = vmax.f32 %v255_v14, %v256_v23  ;;  %v235_v31 = vmax.f32 %v173_v21, %v234_v24  ;;  %v283_v34 = vmax.f32 %v1236_v25, %v282_v28 }
 0x132   :  { %v281_v33 = vmax.f32 %v279_v20, %v280_v27  ;;  %v211_v35 = vmax.f32 %v161_v26, %v210_v29 }
 0x133   :  { %v308_v36 = vsub.f32 %v182_v0, %v257_v30  ;;  %v236_v38 = vrot.slane %v235_v31, 2  ;;  %v284_v40 = vrot.slane %v283_v34, 2 }
 0x134   :  { %v312_v39 = vsub.f32 %v194_v2, %v281_v33  ;;  %v212_v41 = vrot.slane %v211_v35, 2 }
 0x135   :  { %v332_v42 = vmul.f32 1.442695, %v308_v36  ;;  %v237_v32 = vmax.f32 %v235_v31, %v236_v38  ;;  %v285_v45 = vmax.f32 %v283_v34, %v284_v40 }
 0x136   :  { %v1240_v43 = vpop.eup %940  ;;  %v340_v44 = vmul.f32 1.442695, %v312_v39  ;;  %v213_v46 = vmax.f32 %v211_v35, %v212_v41  ;;  %v1242_v47 = vpop.xlane.xlu1 %184 }
 0x137   :  { %v1244_v48 = vpop.eup %942  ;;  %v348_v49 = vrot.slane %v1240_v43, 4  ;;  %944 = vpow2.f32 %v332_v42  ;;  %v238_v50 = vrot.slane %v237_v32, 1  ;;  %v286_v52 = vrot.slane %v285_v45, 1  ;;  %v1264_v22 = vpop.xlane.xlu2 %163 }
 0x138   :  { %v372_v51 = vrot.slane %v1244_v48, 4  ;;  %946 = vpow2.f32 %v340_v44  ;;  %v214_v53 = vrot.slane %v213_v46, 1  ;;  %v258_v56 = vrot.slane %v1242_v47, 4 }
 0x139   :  { %v349_v54 = vadd.f32 %v1240_v43, %v348_v49  ;;  %v239_v55 = vmax.f32 %v237_v32, %v238_v50  ;;  %v287_v62 = vmax.f32 %v285_v45, %v286_v52  ;;  %v216_v30 = vrot.slane %v1264_v22, 4 }
 0x13a   :  { %v373_v57 = vadd.f32 %v1244_v48, %v372_v51  ;;  %v215_v60 = vmax.f32 %v213_v46, %v214_v53  ;;  %v259_v1 = vmax.f32 %v1242_v47, %v258_v56 }
 0x13b   :  { %v350_v58 = vrot.slane %v349_v54, 2  ;;  %v305_v59 = vsub.f32 %v173_v21, %v239_v55  ;;  %v313_v10 = vsub.f32 %v1236_v25, %v287_v62  ;;  %v217_v41 = vmax.f32 %v1264_v22, %v216_v30 }
 0x13c   :  { %v374_v61 = vrot.slane %v373_v57, 2  ;;  %v301_v7 = vsub.f32 %v161_v26, %v215_v60  ;;  %v260_v13 = vrot.slane %v259_v1, 2 }
 0x13d   :  { %v1251_v63 = vpop.eup %944  ;;  %v351_v0 = vadd.f32 %v350_v58, %v349_v54  ;;  %v326_v37 = vmul.f32 1.442695, %v305_v59  ;;  %v342_v21 = vmul.f32 1.442695, %v313_v10  ;;  %v218_v54 = vrot.slane %v217_v41, 2  ;;  %v1284_v58 = vpop.xlane.xlu0 %175 }
 0x13e   :  { %v1254_v2 = vpop.eup %946  ;;  %v375_v3 = vadd.f32 %v374_v61, %v373_v57  ;;  %v396_v4 = vrot.slane %v1251_v63, 4  ;;  %v318_v20 = vmul.f32 1.442695, %v301_v7  ;;  %v261_v27 = vmax.f32 %v259_v1, %v260_v13 }
 0x13f   :  { %v352_v5 = vrot.slane %v351_v0, 1  ;;  %v420_v6 = vrot.slane %v1254_v2, 4  ;;  %948 = vpow2.f32 %v326_v37 }
 0x140   :  { %v376_v8 = vrot.slane %v375_v3, 1  ;;  %v397_v9 = vadd.f32 %v1251_v63, %v396_v4  ;;  %v262_v35 = vrot.slane %v261_v27, 1  ;;  %v240_v4 = vrot.slane %v1284_v58, 4 }
 0x141   :  { %v353_v11 = vadd.f32 %v352_v5, %v351_v0  ;;  %v421_v12 = vadd.f32 %v1254_v2, %v420_v6 }
 0x142   :  { %v1261_v14 = vadd.f32 %v376_v8, %v375_v3  ;;  %v398_v15 = vrot.slane %v397_v9, 2  ;;  %v263_v46 = vmax.f32 %v261_v27, %v262_v35  ;;  %v219_v3 = vmax.f32 %v217_v41, %v218_v54 }
 0x143   :  { %950 = vrcp.f32 %v353_v11  ;;  %v422_v26 = vrot.slane %v421_v12, 2  ;;  %vm449_vm2 = vweird.f32 %v353_v11  ;;  %v453_v52 = vand.u32 2147483647, %v353_v11 }
 0x144   :  { %952 = vrcp.f32 %v1261_v14  ;;  %v399_v24 = vadd.f32 %v398_v15, %v397_v9  ;;  %v455_v53 = vand.u32 2147483648, %v353_v11  ;;  %v309_v61 = vsub.f32 %v1242_v47, %v263_v46 }
 0x145   :  { %v1266_v23 = vpop.eup %948  ;;  %v423_v29 = vadd.f32 %v422_v26, %v421_v12  ;;  %954 = vpow2.f32 %v318_v20  ;;  %vm454_vm5 = vcmp.eq.f32.partialorder %v453_v52, 8.507059e+37  ;;  %v515_v7 = vand.u32 2147483648, %v1261_v14 }
 0x146   :  { %v378_v25 = vrot.slane %v1266_v23, 4  ;;  %v400_v28 = vrot.slane %v399_v24, 1  ;;  %956 = vpow2.f32 %v342_v21  ;;  %v456_v37 = vor.u32 1.1754944e-38, %v455_v53 }
 0x147   :  { %v424_v34 = vrot.slane %v423_v29, 1  ;;  %v334_v47 = vmul.f32 1.442695, %v309_v61  ;;  %vm509_vm6 = vweird.f32 %v1261_v14  ;;  %v220_v15 = vrot.slane %v219_v3, 1 }
 0x148   :  { %v1270_v33 = vadd.f32 %v400_v28, %v399_v24  ;;  %v379_v39 = vadd.f32 %v1266_v23, %v378_v25  ;;  %v241_v26 = vmax.f32 %v1284_v58, %v240_v4  ;;  %v516_v27 = vor.u32 1.1754944e-38, %v515_v7 }
 0x149   :  { %v951_v31 = vpop.eup %950  ;;  %v1276_v32 = vadd.f32 %v424_v34, %v423_v29 }
 0x14a   :  { %v953_v36 = vpop.eup %952  ;;  %v445_v38 = vmul.f32 %v951_v31, %v353_v11  ;;  %958 = vrcp.f32 %v1270_v33  ;;  %vm450_vm1 = vweird.f32 %v951_v31  ;;  %v380_v51 = vrot.slane %v379_v39, 2 }
 0x14b   :  { %v505_v40 = vmul.f32 %v953_v36, %v1261_v14  ;;  %v1278_v44 = vpop.eup %954  ;;  %960 = vrcp.f32 %v1276_v32  ;;  %vm451_vm3 = vmor %vm449_vm2, %vm450_vm1  ;;  %vm510_vm4 = vweird.f32 %v953_v36  ;;  %v513_v11 = vand.u32 2147483647, %v1261_v14 }
 0x14c   :  { %v446_v42 = vsub.f32 1.0, %v445_v38  ;;  %v1280_v49 = vpop.eup %956  ;;  %v354_v57 = vrot.slane %v1278_v44, 4  ;;  %v381_v0 = vadd.f32 %v380_v51, %v379_v39  ;;  %vm511_vm7 = vmor %vm509_vm6, %vm510_vm4  ;;  %962 = vpow2.f32 %v334_v47 }
 0x14d   :  { %v506_v45 = vsub.f32 1.0, %v505_v40  ;;  %v426_v60 = vrot.slane %v1280_v49, 4  ;;  %vm514_vm8 = vcmp.eq.f32.partialorder %v513_v11, 8.507059e+37  ;;  %v573_v40 = vand.u32 2147483647, %v1270_v33 }
 0x14e   :  { %v447_v50 = vmul.f32 %v951_v31, %v446_v42  ;;  %v355_v6 = vadd.f32 %v1278_v44, %v354_v57  ;;  %v382_v12 = vrot.slane %v381_v0, 1  ;;  %v575_v41 = vand.u32 2147483648, %v1270_v33 }
 0x14f   :  { %v507_v55 = vmul.f32 %v953_v36, %v506_v45  ;;  %v427_v9 = vadd.f32 %v1280_v49, %v426_v60  ;;  %vm569_vm10 = vweird.f32 %v1270_v33  ;;  %v635_v53 = vand.u32 2147483648, %v1276_v32 }
 0x150   :  { %v448_v56 = vadd.f32 %v951_v31, %v447_v50  ;;  %v1286_v59 = vpop.eup %958  ;;  %v356_v24 = vrot.slane %v355_v6, 2  ;;  %v1304_v29 = vadd.f32 %v382_v12, %v381_v0  ;;  %v633_v50 = vand.u32 2147483647, %v1276_v32 }
 0x151   :  { %v565_v1 = vmul.f32 %v1286_v59, %v1270_v33  ;;  %v508_v5 = vadd.f32 %v953_v36, %v507_v55  ;;  %v1296_v10 = vpop.eup %960  ;;  %v428_v28 = vrot.slane %v427_v9, 2  ;;  %vm570_vm9 = vweird.f32 %v1286_v59 }
 0x152   :  { %v452_v62 = vsel %vm451_vm3, %v951_v31, %v448_v56  ;;  %v625_v25 = vmul.f32 %v1296_v10, %v1276_v32  ;;  %v221_v31 = vmax.f32 %v219_v3, %v220_v15  ;;  %v357_v35 = vadd.f32 %v356_v24, %v355_v6  ;;  %v1312_v42 = vpop.eup %962  ;;  %vm1322_vm11 = vmor %vm569_vm10, %vm570_vm9  ;;  %v1349_v6 = vpop.xlane.xlu1 %190 }
 0x153   :  { %v457_v8 = vsel %vm454_vm5, %v456_v37, %v452_v62  ;;  %v566_v13 = vsub.f32 1.0, %v565_v1  ;;  %v512_v20 = vsel %vm511_vm7, %v953_v36, %v508_v5  ;;  %v429_v38 = vadd.f32 %v428_v28, %v427_v9 }
 0x154   :  { %v458_v21 = vmul.f32 %v1240_v43, %v457_v8  ;;  %v517_v14 = vsel %vm514_vm8, %v516_v27, %v512_v20  ;;  %v242_v43 = vrot.slane %v241_v26, 2  ;;  %v626_v36 = vsub.f32 1.0, %v625_v25 }
 0x155   :  { %v567_v30 = vmul.f32 %v1286_v59, %v566_v13  ;;  %v518_v39 = vmul.f32 %v1244_v48, %v517_v14  ;;  %964 = vrcp.f32 %v1304_v29  ;;  %v358_v51 = vrot.slane %v357_v35, 1 }
 0x156   :  { %v684_v34 = vmul.f32 %v458_v21, %v1121_v16  ;;  %v302_v16 = vsub.f32 %v1264_v22, %v221_v31  ;;  %v243_v52 = vmax.f32 %v241_v26, %v242_v43  ;;  %v627_v48 = vmul.f32 %v1296_v10, %v626_v36  ;;  %v1366_v26 = vpop.xlane.xlu2 %187  ;;  %v1380_v36 = vpop.xlane.xlu0 %166 }
 0x157   :  { %v568_v45 = vadd.f32 %v1286_v59, %v567_v30  ;;  %v430_v54 = vrot.slane %v429_v38, 1  ;;  %v688_v55 = vmul.f32 %v518_v39, %v1126_v17  ;;  %vm1326_vm12 = vcmp.eq.f32.partialorder %v573_v40, 8.507059e+37 }
 0x158   :  { %v700_v46 = vrot.slane %v684_v34, 4  ;;  %v576_v57 = vor.u32 1.1754944e-38, %v575_v41  ;;  %v402_v60 = vrot.slane %v1312_v42, 4  ;;  %vm629_vm13 = vweird.f32 %v1276_v32 }
 0x159   :  { %v572_v33 = vsel %vm1322_vm11, %v1286_v59, %v568_v45  ;;  %v530_v61 = vand.u32 2147483648, %v1304_v29  ;;  %v320_v17 = vmul.f32 1.442695, %v302_v16  ;;  %vm1338_vm14 = vcmp.eq.f32.partialorder %v633_v50, 8.507059e+37 }
 0x15a   :  { %v701_v0 = vadd.f32 %v700_v46, %v684_v34  ;;  %v1342_v1 = vadd.f32 %v358_v51, %v357_v35  ;;  %v403_v3 = vadd.f32 %v1312_v42, %v402_v60  ;;  %v628_v4 = vadd.f32 %v1296_v10, %v627_v48  ;;  %v1404_v56 = vpop.xlane.xlu1 %199 }
 0x15b   :  { %v1336_v62 = vpop.eup %964  ;;  %vm630_vm15 = vweird.f32 %v1296_v10  ;;  %v636_v59 = vor.u32 1.1754944e-38, %v635_v53  ;;  %v1347_v5 = vadd.f32 %v430_v54, %v429_v38  ;;  %v724_v7 = vrot.slane %v688_v55, 4 }
 0x15c   :  { %v577_v8 = vsel %vm1326_vm12, %v576_v57, %v572_v33  ;;  %v404_v9 = vrot.slane %v403_v3, 2  ;;  %966 = vpow2.f32 %v320_v17  ;;  %v520_v47 = vmul.f32 %v1336_v62, %v1304_v29  ;;  %vm1360_vm0 = vmor %vm629_vm13, %vm630_vm15 }
 0x15d   :  { %v528_v11 = vand.u32 2147483647, %v1304_v29  ;;  %v1356_v12 = vor.u32 1.1754944e-38, %v530_v61  ;;  %v244_v13 = vrot.slane %v243_v52, 1  ;;  %v702_v15 = vrot.slane %v701_v0, 2 }
 0x15e   :  { %968 = vrcp.f32 %v1342_v1  ;;  %v405_v21 = vadd.f32 %v404_v9, %v403_v3  ;;  %v270_v24 = vrot.slane %v1349_v6, 4  ;;  %v578_v27 = vmul.f32 %v1251_v63, %v577_v8 }
 0x15f   :  { %v632_v25 = vsel %vm1360_vm0, %v1296_v10, %v628_v4  ;;  %970 = vrcp.f32 %v1347_v5  ;;  %v245_v32 = vmax.f32 %v243_v52, %v244_v13  ;;  %v1373_v28 = vadd.f32 %v724_v7, %v688_v55 }
 0x160   :  { %v648_v14 = vand.u32 2147483647, %v1347_v5  ;;  %v406_v30 = vrot.slane %v405_v21, 1  ;;  %v271_v31 = vmax.f32 %v1349_v6, %v270_v24  ;;  %v521_v34 = vsub.f32 1.0, %v520_v47 }
 0x161   :  { %v650_v35 = vand.u32 2147483648, %v1347_v5  ;;  %v306_v43 = vsub.f32 %v1284_v58, %v245_v32  ;;  %v264_v63 = vrot.slane %v1366_v26, 4  ;;  %v703_v38 = vadd.f32 %v702_v15, %v701_v0 }
 0x162   :  { %v1382_v10 = vpop.eup %966  ;;  %v637_v39 = vsel %vm1338_vm14, %v636_v59, %v632_v25  ;;  %v1386_v40 = vadd.f32 %v406_v30, %v405_v21  ;;  %v272_v41 = vrot.slane %v271_v31, 2  ;;  %v692_v45 = vmul.f32 %v578_v27, %v1131_v18 }
 0x163   :  { %v360_v16 = vrot.slane %v1382_v10, 4  ;;  %v328_v46 = vmul.f32 1.442695, %v306_v43  ;;  %v265_v58 = vmax.f32 %v1366_v26, %v264_v63  ;;  %v726_v51 = vrot.slane %v1373_v28, 2 }
 0x164   :  { %v1391_v50 = vpop.eup %968  ;;  %vm525_vm1 = vweird.f32 %v1336_v62  ;;  %972 = vrcp.f32 %v1386_v40  ;;  %v222_v52 = vrot.slane %v1380_v36, 4  ;;  %v638_v53 = vmul.f32 %v1254_v2, %v637_v39 }
 0x165   :  { %v1397_v48 = vpop.eup %970  ;;  %v522_v18 = vmul.f32 %v1336_v62, %v521_v34  ;;  %v1401_v54 = vor.u32 1.1754944e-38, %v650_v35  ;;  %v361_v55 = vadd.f32 %v1382_v10, %v360_v16  ;;  %vm524_vm2 = vweird.f32 %v1304_v29 }
 0x166   :  { %v468_v22 = vand.u32 2147483647, %v1342_v1  ;;  %974 = vpow2.f32 %v328_v46  ;;  %v273_v57 = vmax.f32 %v271_v31, %v272_v41  ;;  %v266_v60 = vrot.slane %v265_v58, 2  ;;  %vm1447_vm6 = vmor %vm524_vm2, %vm525_vm1 }
 0x167   :  { %v704_v33 = vrot.slane %v703_v38, 1  ;;  %v748_v61 = vrot.slane %v692_v45, 4  ;;  %v460_v2 = vmul.f32 %v1391_v50, %v1342_v1  ;;  %v362_v17 = vrot.slane %v361_v55, 2 }
 0x168   :  { %v274_v0 = vrot.slane %v273_v57, 1  ;;  %v267_v37 = vmax.f32 %v265_v58, %v266_v60  ;;  %v223_v3 = vmax.f32 %v1380_v36, %v222_v52  ;;  %v288_v4 = vrot.slane %v1404_v56, 4 }
 0x169   :  { %v696_v59 = vmul.f32 %v638_v53, %v1136_v19  ;;  %v523_v7 = vadd.f32 %v1336_v62, %v522_v18  ;;  %v640_v8 = vmul.f32 %v1397_v48, %v1347_v5  ;;  %v363_v9 = vadd.f32 %v362_v17, %v361_v55 }
 0x16a   :  { %v1416_v47 = vpop.eup %972  ;;  %v275_v13 = vmax.f32 %v273_v57, %v274_v0  ;;  %v268_v15 = vrot.slane %v267_v37, 1  ;;  %v224_v20 = vrot.slane %v223_v3, 2  ;;  %v289_v21 = vmax.f32 %v1404_v56, %v288_v4 }
 0x16b   :  { %v1419_v24 = vadd.f32 %v748_v61, %v692_v45  ;;  %vm1423_vm3 = vcmp.eq.f32.partialorder %v528_v11, 8.507059e+37  ;;  %v461_v19 = vsub.f32 1.0, %v460_v2  ;;  %v470_v25 = vand.u32 2147483648, %v1342_v1  ;;  %v1438_v45 = vpop.xlane.xlu2 %178 }
 0x16c   :  { %v364_v32 = vrot.slane %v363_v9, 1  ;;  %v1428_v30 = vpop.eup %974  ;;  %v311_v31 = vsub.f32 %v1349_v6, %v275_v13  ;;  %v269_v34 = vmax.f32 %v267_v37, %v268_v15  ;;  %v225_v35 = vmax.f32 %v223_v3, %v224_v20 }
 0x16d   :  { %v290_v43 = vrot.slane %v289_v21, 2  ;;  %v641_v63 = vsub.f32 1.0, %v640_v8  ;;  %vm645_vm4 = vweird.f32 %v1397_v48  ;;  %vm464_vm5 = vweird.f32 %v1342_v1 }
 0x16e   :  { %v580_v11 = vmul.f32 %v1416_v47, %v1386_v40  ;;  %v1435_v39 = vadd.f32 %v364_v32, %v363_v9  ;;  %v384_v41 = vrot.slane %v1428_v30, 4  ;;  %v338_v16 = vmul.f32 1.442695, %v311_v31 }
 0x16f   :  { %v310_v6 = vsub.f32 %v1366_v26, %v269_v34  ;;  %v226_v46 = vrot.slane %v225_v35, 1  ;;  %v291_v58 = vmax.f32 %v289_v21, %v290_v43  ;;  %v1441_v52 = vadd.f32 %v704_v33, %v703_v38 }
 0x170   :  { %v772_v53 = vrot.slane %v696_v59, 4  ;;  %vm644_vm7 = vweird.f32 %v1347_v5  ;;  %v462_v55 = vmul.f32 %v1391_v50, %v461_v19  ;;  %976 = vrcp.f32 %v1435_v39 }
 0x171   :  { %v527_v26 = vsel %vm1447_vm6, %v1336_v62, %v523_v7  ;;  %v385_v38 = vadd.f32 %v1428_v30, %v384_v41  ;;  %978 = vpow2.f32 %v338_v16  ;;  %v246_v57 = vrot.slane %v1438_v45, 4  ;;  %v1465_v62 = vpop.xlane.xlu0 %202  ;;  %vm1510_vm12 = vmor %vm644_vm7, %vm645_vm4 }
 0x172   :  { %v642_v29 = vmul.f32 %v1397_v48, %v641_v63  ;;  %vm1460_vm8 = vcmp.eq.f32.partialorder %v468_v22, 8.507059e+37  ;;  %v471_v33 = vor.u32 1.1754944e-38, %v470_v25  ;;  %v336_v61 = vmul.f32 1.442695, %v310_v6 }
 0x173   :  { %v227_v2 = vmax.f32 %v225_v35, %v226_v46  ;;  %v750_v17 = vrot.slane %v1419_v24, 2  ;;  %v581_v0 = vsub.f32 1.0, %v580_v11  ;;  %v386_v37 = vrot.slane %v385_v38, 2 }
 0x174   :  { %v292_v3 = vrot.slane %v291_v58, 1  ;;  %v463_v4 = vadd.f32 %v1391_v50, %v462_v55  ;;  %vm465_vm9 = vweird.f32 %v1391_v50  ;;  %980 = vpow2.f32 %v336_v61 }
 0x175   :  { %v303_v22 = vsub.f32 %v1380_v36, %v227_v2  ;;  %v532_v7 = vsel %vm1423_vm3, %v1356_v12, %v527_v26  ;;  %vm1475_vm10 = vcmp.eq.f32.partialorder %v648_v14, 8.507059e+37  ;;  %v387_v9 = vadd.f32 %v386_v37, %v385_v38  ;;  %vm1490_vm11 = vmor %vm464_vm5, %vm465_vm9 }
 0x176   :  { %v293_v13 = vmax.f32 %v291_v58, %v292_v3  ;;  %v247_v15 = vmax.f32 %v1438_v45, %v246_v57  ;;  %v1480_v20 = vpop.eup %976  ;;  %v1482_v21 = vadd.f32 %v772_v53, %v696_v59  ;;  %v643_v36 = vadd.f32 %v1397_v48, %v642_v29 }
 0x177   :  { %v322_v19 = vmul.f32 1.442695, %v303_v22  ;;  %v294_v27 = vrot.slane %v1465_v62, 4  ;;  %v1486_v12 = vpop.eup %978  ;;  %v582_v25 = vmul.f32 %v1416_v47, %v581_v0  ;;  %v475_v32 = vmul.f32 %v1480_v20, %v1435_v39 }
 0x178   :  { %v388_v59 = vrot.slane %v387_v9, 1  ;;  %v314_v31 = vsub.f32 %v1404_v56, %v293_v13  ;;  %v467_v34 = vsel %vm1490_vm11, %v1391_v50, %v463_v4  ;;  %v414_v35 = vrot.slane %v1486_v12, 4 }
 0x179   :  { %982 = vpow2.f32 %v322_v19  ;;  %v248_v1 = vrot.slane %v247_v15, 2  ;;  %v1503_v43 = vadd.f32 %v750_v17, %v1419_v24  ;;  %v533_v63 = vmul.f32 %v1266_v23, %v532_v7 }
 0x17a   :  { %v1514_v56 = vadd.f32 %v388_v59, %v387_v9  ;;  %v344_v50 = vmul.f32 1.442695, %v314_v31  ;;  %v1516_v41 = vpop.eup %980  ;;  %v647_v24 = vsel %vm1510_vm12, %v1397_v48, %v643_v36  ;;  %v476_v16 = vsub.f32 1.0, %v475_v32  ;;  %v1005_v59 = vld [vmem:[%s1781_s0 + $0x28] sm:$0xff] }
 0x17b   :  { %v415_v23 = vadd.f32 %v1486_v12, %v414_v35  ;;  %v249_v6 = vmax.f32 %v247_v15, %v248_v1  ;;  %v472_v5 = vsel %vm1460_vm8, %v471_v33, %v467_v34  ;;  %v583_v46 = vadd.f32 %v1416_v47, %v582_v25  ;;  %v1004_v25 = vld [vmem:[%s1781_s0 + $0x8] sm:$0xff] }
 0x17c   :  { %vm585_vm13 = vweird.f32 %v1416_v47  ;;  %v295_v58 = vmax.f32 %v1465_v62, %v294_v27  ;;  %v590_v53 = vand.u32 2147483648, %v1386_v40  ;;  %984 = vrcp.f32 %v1514_v56 }
 0x17d   :  { %v416_v18 = vrot.slane %v415_v23, 2  ;;  %v408_v48 = vrot.slane %v1516_v41, 4  ;;  %vm584_vm14 = vweird.f32 %v1386_v40  ;;  %v588_v55 = vand.u32 2147483647, %v1386_v40 }
 0x17e   :  { %986 = vpow2.f32 %v344_v50  ;;  %v250_v26 = vrot.slane %v249_v6, 1  ;;  %v652_v57 = vsel %vm1475_vm10, %v1401_v54, %v647_v24  ;;  %vm1537_vm15 = vmor %vm584_vm14, %vm585_vm13  ;;  %v477_v60 = vmul.f32 %v1480_v20, %v476_v16 }
 0x17f   :  { %v1532_v38 = vpop.eup %982  ;;  %v417_v33 = vadd.f32 %v416_v18, %v415_v23  ;;  %v409_v61 = vadd.f32 %v1516_v41, %v408_v48  ;;  %v587_v40 = vsel %vm1537_vm15, %v1416_v47, %v583_v46  ;;  %v296_v0 = vrot.slane %v295_v58, 2 }
 0x180   :  { %v366_v2 = vrot.slane %v1532_v38, 4  ;;  %v251_v17 = vmax.f32 %v249_v6, %v250_v26  ;;  %v473_v37 = vmul.f32 %v1278_v44, %v472_v5  ;;  %v591_v54 = vor.u32 1.1754944e-38, %v590_v53 }
 0x181   :  { %v418_v3 = vrot.slane %v417_v33, 1  ;;  %v410_v4 = vrot.slane %v409_v61, 2  ;;  %vm589_vm0 = vcmp.eq.f32.partialorder %v588_v55, 8.507059e+37  ;;  %v485_v22 = vand.u32 2147483648, %v1435_v39 }
 0x182   :  { %v367_v7 = vadd.f32 %v1532_v38, %v366_v2  ;;  %v307_v8 = vsub.f32 %v1438_v45, %v251_v17  ;;  %v1551_v9 = vpop.eup %984  ;;  %v592_v13 = vsel %vm589_vm0, %v591_v54, %v587_v40  ;;  %v478_v47 = vadd.f32 %v1480_v20, %v477_v60  ;;  %v1007_v17 = vld [vmem:[%s1781_s0 + $0x68] sm:$0xff] }
 0x183   :  { %vm480_vm1 = vweird.f32 %v1480_v20  ;;  %v1555_v15 = vadd.f32 %v418_v3, %v417_v33  ;;  %v411_v36 = vadd.f32 %v410_v4, %v409_v61  ;;  %v297_v14 = vmax.f32 %v295_v58, %v296_v0  ;;  %v1006_v58 = vld [vmem:[%s1781_s0 + $0x48] sm:$0xff] }
 0x184   :  { %v1557_v44 = vpop.eup %986  ;;  %v368_v19 = vrot.slane %v367_v7, 2  ;;  %v330_v27 = vmul.f32 1.442695, %v307_v8  ;;  %v685_v45 = vmul.f32 %v1004_v25, %v473_v37  ;;  %vm479_vm2 = vweird.f32 %v1435_v39 }
 0x185   :  { %v483_v32 = vand.u32 2147483647, %v1435_v39  ;;  %988 = vrcp.f32 %v1555_v15  ;;  %v1568_v31 = vmul.f32 %v1005_v59, %v533_v63  ;;  %v593_v34 = vmul.f32 %v1312_v42, %v592_v13  ;;  %vm1573_vm3 = vmor %vm479_vm2, %vm480_vm1 }
 0x186   :  { %v535_v1 = vmul.f32 %v1551_v9, %v1514_v56  ;;  %v412_v39 = vrot.slane %v411_v36, 1  ;;  %v482_v11 = vsel %vm1573_vm3, %v1480_v20, %v478_v47  ;;  %v369_v50 = vadd.f32 %v368_v19, %v367_v7 }
 0x187   :  { %v432_v63 = vrot.slane %v1557_v44, 4  ;;  %990 = vpow2.f32 %v330_v27  ;;  %v653_v42 = vmul.f32 %v1280_v49, %v652_v57  ;;  %v486_v24 = vor.u32 1.1754944e-38, %v485_v22 }
 0x188   :  { %v1584_v16 = vadd.f32 %v412_v39, %v411_v36  ;;  %v298_v23 = vrot.slane %v297_v14, 1  ;;  %v706_v6 = vrot.slane %v685_v45, 4  ;;  %vm484_vm4 = vcmp.eq.f32.partialorder %v483_v32, 8.507059e+37 }
 0x189   :  { %v370_v5 = vrot.slane %v369_v50, 1  ;;  %v433_v46 = vadd.f32 %v1557_v44, %v432_v63  ;;  %v1590_v20 = vmul.f32 %v1006_v58, %v593_v34  ;;  %v487_v53 = vsel %vm484_vm4, %v486_v24, %v482_v11 }
 0x18a   :  { %v536_v18 = vsub.f32 1.0, %v535_v1  ;;  %992 = vrcp.f32 %v1584_v16  ;;  %v752_v48 = vrot.slane %v1503_v43, 1  ;;  %v774_v55 = vrot.slane %v1482_v21, 2 }
 0x18b   :  { %v1593_v49 = vpop.eup %988  ;;  %v1597_v26 = vadd.f32 %v370_v5, %v369_v50  ;;  %v434_v57 = vrot.slane %v433_v46, 2  ;;  %v543_v29 = vand.u32 2147483647, %v1514_v56  ;;  %v545_v60 = vand.u32 2147483648, %v1514_v56 }
 0x18c   :  { %v610_v33 = vmul.f32 %v1593_v49, %v1555_v15  ;;  %v299_v61 = vmax.f32 %v297_v14, %v298_v23  ;;  %v730_v2 = vrot.slane %v1568_v31, 4  ;;  %v1609_v0 = vmul.f32 %v1007_v17, %v653_v42  ;;  %v1008_v14 = vld [vmem:[%s1781_s0 + $0x10] sm:$0xff] }
 0x18d   :  { %v1603_v40 = vpop.eup %990  ;;  %v488_v37 = vmul.f32 %v1382_v10, %v487_v53  ;;  %994 = vrcp.f32 %v1597_v26  ;;  %v1613_v54 = vadd.f32 %v706_v6, %v685_v45  ;;  %v754_v3 = vrot.slane %v1590_v20, 4 }
 0x18e   :  { %v537_v4 = vmul.f32 %v1551_v9, %v536_v18  ;;  %v611_v22 = vsub.f32 1.0, %v610_v33  ;;  %vm539_vm5 = vweird.f32 %v1514_v56  ;;  %v618_v7 = vand.u32 2147483647, %v1555_v15 }
 0x18f   :  { %v435_v8 = vadd.f32 %v434_v57, %v433_v46  ;;  %v390_v13 = vrot.slane %v1603_v40, 4  ;;  %vm540_vm6 = vweird.f32 %v1551_v9  ;;  %vm1621_vm7 = vcmp.eq.f32.partialorder %v543_v29, 8.507059e+37 }
 0x190   :  { %v993_v47 = vpop.eup %992  ;;  %v546_v36 = vor.u32 1.1754944e-38, %v545_v60  ;;  %v612_v19 = vmul.f32 %v1593_v49, %v611_v22  ;;  %v315_v27 = vsub.f32 %v1465_v62, %v299_v61  ;;  %v1630_v25 = vmul.f32 %v1008_v14, %v488_v37  ;;  %vm1652_vm12 = vmor %vm539_vm5, %vm540_vm6 }
 0x191   :  { %vm614_vm8 = vweird.f32 %v1555_v15  ;;  %v620_v45 = vand.u32 2147483648, %v1555_v15  ;;  %v595_v32 = vmul.f32 %v993_v47, %v1584_v16  ;;  %v538_v59 = vadd.f32 %v1551_v9, %v537_v4 }
 0x192   :  { %v436_v34 = vrot.slane %v435_v8, 1  ;;  %v391_v35 = vadd.f32 %v1603_v40, %v390_v13  ;;  %v346_v1 = vmul.f32 1.442695, %v315_v27  ;;  %v613_v62 = vadd.f32 %v1593_v49, %v612_v19 }
 0x193   :  { %v995_v39 = vpop.eup %994  ;;  %vm615_vm9 = vweird.f32 %v1593_v49  ;;  %vm1639_vm10 = vcmp.eq.f32.partialorder %v618_v7, 8.507059e+37  ;;  %v596_v50 = vsub.f32 1.0, %v595_v32  ;;  %vm599_vm11 = vweird.f32 %v1584_v16 }
 0x194   :  { %v605_v63 = vand.u32 2147483648, %v1584_v16  ;;  %v490_v42 = vmul.f32 %v995_v39, %v1597_v26  ;;  %v1646_v24 = vadd.f32 %v436_v34, %v435_v8  ;;  %vm600_vm13 = vweird.f32 %v993_v47  ;;  %vm1661_vm14 = vmor %vm614_vm8, %vm615_vm9 }
 0x195   :  { %v597_v6 = vmul.f32 %v993_v47, %v596_v50  ;;  %v392_v5 = vrot.slane %v391_v35, 2  ;;  %996 = vpow2.f32 %v346_v1  ;;  %v542_v46 = vsel %vm1652_vm12, %v1551_v9, %v538_v59  ;;  %vm601_vm15 = vmor %vm599_vm11, %vm600_vm13  ;;  %v1009_v1 = vld [vmem:[%s1781_s0 + $0x30] sm:$0xff] }
 0x196   :  { %v603_v56 = vand.u32 2147483647, %v1584_v16  ;;  %v491_v53 = vsub.f32 1.0, %v490_v42  ;;  %998 = vrcp.f32 %v1646_v24  ;;  %v617_v18 = vsel %vm1661_vm14, %v1593_v49, %v613_v62  ;;  %v1012_v42 = vld [vmem:[%s1781_s0 + $0x50] sm:$0xff] }
 0x197   :  { %v598_v57 = vadd.f32 %v993_v47, %v597_v6  ;;  %v500_v29 = vand.u32 2147483648, %v1597_v26  ;;  %v393_v60 = vadd.f32 %v392_v5, %v391_v35  ;;  %v621_v9 = vor.u32 1.1754944e-38, %v620_v45 }
 0x198   :  { %v492_v15 = vmul.f32 %v995_v39, %v491_v53  ;;  %vm495_vm0 = vweird.f32 %v995_v39  ;;  %v498_v33 = vand.u32 2147483647, %v1597_v26  ;;  %v547_v61 = vsel %vm1621_vm7, %v546_v36, %v542_v46 }
 0x199   :  { %v602_v17 = vsel %vm601_vm15, %v993_v47, %v598_v57  ;;  %v606_v37 = vor.u32 1.1754944e-38, %v605_v63  ;;  %v394_v4 = vrot.slane %v393_v60, 1  ;;  %v622_v49 = vsel %vm1639_vm10, %v621_v9, %v617_v18 }
 0x19a   :  { %vm604_vm1 = vcmp.eq.f32.partialorder %v603_v56, 8.507059e+37  ;;  %v493_v22 = vadd.f32 %v995_v39, %v492_v15  ;;  %vm494_vm2 = vweird.f32 %v1597_v26  ;;  %v712_v16 = vrot.slane %v1630_v25, 4 }
 0x19b   :  { %v1679_v7 = vpop.eup %996  ;;  %v607_v8 = vsel %vm604_vm1, %v606_v37, %v602_v17  ;;  %vm496_vm3 = vmor %vm494_vm2, %vm495_vm0  ;;  %v501_v13 = vor.u32 1.1754944e-38, %v500_v29  ;;  %v1682_v19 = vadd.f32 %v394_v4, %v393_v60  ;;  %v548_v47 = vmul.f32 %v1428_v30, %v547_v61 }
 0x19c   :  { %v999_v10 = vpop.eup %998  ;;  %v497_v36 = vsel %vm496_vm3, %v995_v39, %v493_v22  ;;  %vm499_vm4 = vcmp.eq.f32.partialorder %v498_v33, 8.507059e+37  ;;  %v438_v27 = vrot.slane %v1679_v7, 4  ;;  %v1689_v26 = vadd.f32 %v730_v2, %v1568_v31 }
 0x19d   :  { %v623_v14 = vmul.f32 %v1486_v12, %v622_v49  ;;  %v502_v45 = vsel %vm499_vm4, %v501_v13, %v497_v36  ;;  %v655_v32 = vmul.f32 %v999_v10, %v1646_v24  ;;  %v708_v59 = vrot.slane %v1613_v54, 2 }
 0x19e   :  { %v608_v34 = vmul.f32 %v1516_v41, %v607_v8  ;;  %v503_v30 = vmul.f32 %v1532_v38, %v502_v45  ;;  %1000 = vrcp.f32 %v1682_v19  ;;  %v778_v35 = vrot.slane %v1609_v0, 4  ;;  %v1010_v41 = vld [vmem:[%s1781_s0 + $0x18] sm:$0xff] }
 0x19f   :  { %v755_v31 = vadd.f32 %v754_v3, %v1590_v20  ;;  %v713_v2 = vadd.f32 %v712_v16, %v1630_v25  ;;  %v656_v12 = vsub.f32 1.0, %v655_v32  ;;  %v690_v39 = vmul.f32 %v1009_v1, %v548_v47  ;;  %v1011_v20 = vld [vmem:[%s1781_s0 + $0x58] sm:$0xff] }
 0x1a0   :  { %v687_v38 = vmul.f32 %v1010_v41, %v503_v30  ;;  %v665_v62 = vand.u32 2147483648, %v1646_v24  ;;  %v439_v11 = vadd.f32 %v1679_v7, %v438_v27  ;;  %v695_v3 = vmul.f32 %v1011_v20, %v623_v14 }
 0x1a1   :  { %v657_v25 = vmul.f32 %v999_v10, %v656_v12  ;;  %vm660_vm5 = vweird.f32 %v999_v10  ;;  %v663_v50 = vand.u32 2147483647, %v1646_v24  ;;  %v709_v63 = vadd.f32 %v708_v59, %v1613_v54 }
 0x1a2   :  { %v694_v23 = vmul.f32 %v1012_v42, %v608_v34  ;;  %v718_v6 = vrot.slane %v687_v38, 4  ;;  %v440_v5 = vrot.slane %v439_v11, 2  ;;  %v756_v46 = vrot.slane %v755_v31, 2 }
 0x1a3   :  { %v714_v58 = vrot.slane %v713_v2, 2  ;;  %v658_v56 = vadd.f32 %v999_v10, %v657_v25  ;;  %vm659_vm6 = vweird.f32 %v1646_v24  ;;  %v736_v18 = vrot.slane %v690_v39, 4 }
 0x1a4   :  { %v1001_v53 = vpop.eup %1000  ;;  %v719_v57 = vadd.f32 %v718_v6, %v687_v38  ;;  %vm661_vm7 = vmor %vm659_vm6, %vm660_vm5  ;;  %v666_v29 = vor.u32 1.1754944e-38, %v665_v62  ;;  %v441_v60 = vadd.f32 %v440_v5, %v439_v11  ;;  %v766_v9 = vrot.slane %v695_v3, 4 }
 0x1a5   :  { %v662_v54 = vsel %vm661_vm7, %v999_v10, %v658_v56  ;;  %vm664_vm8 = vcmp.eq.f32.partialorder %v663_v50, 8.507059e+37  ;;  %v550_v15 = vmul.f32 %v1001_v53, %v1682_v19  ;;  %v760_v33 = vrot.slane %v694_v23, 4 }
 0x1a6   :  { %v720_v61 = vrot.slane %v719_v57, 2  ;;  %v667_v17 = vsel %vm664_vm8, %v666_v29, %v662_v54  ;;  %v442_v37 = vrot.slane %v441_v60, 1  ;;  %v710_v4 = vrot.slane %v709_v63, 1 }
 0x1a7   :  { %v757_v49 = vadd.f32 %v756_v46, %v755_v31  ;;  %v715_v22 = vadd.f32 %v714_v58, %v713_v2  ;;  %v551_v16 = vsub.f32 1.0, %v550_v15  ;;  %v668_v24 = vmul.f32 %v1557_v44, %v667_v17  ;;  %v1013_v31 = vld [vmem:[%s1781_s0 + $0x70] sm:$0xff] }
 0x1a8   :  { %v560_v8 = vand.u32 2147483648, %v1682_v19  ;;  %v1722_v13 = vadd.f32 %v442_v37, %v441_v60  ;;  %v732_v47 = vrot.slane %v1689_v26, 2  ;;  %v721_v10 = vadd.f32 %v720_v61, %v719_v57 }
 0x1a9   :  { %v552_v36 = vmul.f32 %v1001_v53, %v551_v16  ;;  %vm555_vm9 = vweird.f32 %v1001_v53  ;;  %v558_v27 = vand.u32 2147483647, %v1682_v19  ;;  %v767_v14 = vadd.f32 %v766_v9, %v695_v3 }
 0x1aa   :  { %v761_v45 = vadd.f32 %v760_v33, %v694_v23  ;;  %1002 = vrcp.f32 %v1722_v13  ;;  %v737_v32 = vadd.f32 %v736_v18, %v690_v39  ;;  %v758_v59 = vrot.slane %v757_v49, 1 }
 0x1ab   :  { %v553_v34 = vadd.f32 %v1001_v53, %v552_v36  ;;  %vm554_vm10 = vweird.f32 %v1682_v19  ;;  %v727_v44 = vadd.f32 %v726_v51, %v1373_v28  ;;  %v716_v30 = vrot.slane %v715_v22, 1 }
 0x1ac   :  { %v698_v2 = vmul.f32 %v1013_v31, %v668_v24  ;;  %vm556_vm11 = vmor %vm554_vm10, %vm555_vm9  ;;  %v561_v12 = vor.u32 1.1754944e-38, %v560_v8  ;;  %v733_v1 = vadd.f32 %v732_v47, %v1689_v26  ;;  %v1738_v39 = vadd.f32 %v778_v35, %v1609_v0  ;;  %v1014_v0 = vld [vmem:[%s1781_s0 + $0x38] sm:$0xff] }
 0x1ad   :  { %v557_v19 = vsel %vm556_vm11, %v1001_v53, %v553_v34  ;;  %vm559_vm12 = vcmp.eq.f32.partialorder %v558_v27, 8.507059e+37  ;;  %v722_v41 = vrot.slane %v721_v10, 1  ;;  %v768_v38 = vrot.slane %v767_v14, 2 }
 0x1ae   :  { %v762_v28 = vrot.slane %v761_v45, 2  ;;  %v562_v51 = vsel %vm559_vm12, %v561_v12, %v557_v19  ;;  %v738_v62 = vrot.slane %v737_v32, 2  ;;  %v711_v11 = vadd.f32 %v710_v4, %v709_v63 }
 0x1af   :  { %v1740_v20 = vadd.f32 %v758_v59, %v757_v49  ;;  %v563_v3 = vmul.f32 %v1603_v40, %v562_v51  ;;  %v728_v25 = vrot.slane %v727_v44, 1  ;;  %v784_v26 = vrot.slane %v698_v2, 4 }
 0x1b0   :  { %v1003_v50 = vpop.eup %1002  ;;  %v717_v42 = vadd.f32 %v716_v30, %v715_v22  ;;  %v734_v23 = vrot.slane %v733_v1, 1  ;;  %vm812_vm13 = vcmask 1041409   ;;  %v723_v5 = vadd.f32 %v722_v41, %v721_v10 }
 0x1b1   :  { %v691_v35 = vmul.f32 %v1014_v0, %v563_v3  ;;  %v670_v6 = vmul.f32 %v1003_v50, %v1722_v13  ;;  %vm814_vm14 = vcmask 1042434   ;;  %v769_v63 = vadd.f32 %v768_v38, %v767_v14 }
 0x1b2   :  { %v763_v46 = vadd.f32 %v762_v28, %v761_v45  ;;  %v739_v58 = vadd.f32 %v738_v62, %v737_v32  ;;  %vm816_vm15 = vcmask 1043459   ;;  %v678_v56 = vand.u32 2147483647, %v1722_v13 }
 0x1b3   :  { %v671_v40 = vsub.f32 1.0, %v670_v6  ;;  %v742_v53 = vrot.slane %v691_v35, 4  ;;  %v813_v18 = vsel %vm812_vm13, %v711_v11, %v1441_v52  ;;  %v785_v57 = vadd.f32 %v784_v26, %v698_v2 }
 0x1b4   :  { %v680_v29 = vand.u32 2147483648, %v1722_v13  ;;  %v815_v60 = vsel %vm814_vm14, %v717_v42, %v813_v18  ;;  %vm818_vm0 = vcmask 1044484   ;;  %vm675_vm1 = vweird.f32 %v1003_v50 }
 0x1b5   :  { %v672_v9 = vmul.f32 %v1003_v50, %v671_v40  ;;  %v743_v54 = vadd.f32 %v742_v53, %v691_v35  ;;  %v817_v15 = vsel %vm816_vm15, %v723_v5, %v815_v60  ;;  %v764_v33 = vrot.slane %v763_v46, 1 }
 0x1b6   :  { %v729_v61 = vadd.f32 %v728_v25, %v727_v44  ;;  %v735_v17 = vadd.f32 %v734_v23, %v733_v1  ;;  %v770_v37 = vrot.slane %v769_v63, 1  ;;  %vm674_vm2 = vweird.f32 %v1722_v13 }
 0x1b7   :  { %v673_v4 = vadd.f32 %v1003_v50, %v672_v9  ;;  %v740_v49 = vrot.slane %v739_v58, 1  ;;  %v744_v52 = vrot.slane %v743_v54, 2  ;;  %vm676_vm3 = vmor %vm674_vm2, %vm675_vm1  ;;  %v681_v22 = vor.u32 1.1754944e-38, %v680_v29 }
 0x1b8   :  { %v786_v16 = vrot.slane %v785_v57, 2  ;;  %v819_v24 = vsel %vm818_vm0, %v729_v61, %v817_v15  ;;  %vm820_vm4 = vcmask 1045509   ;;  %vm679_vm5 = vcmp.eq.f32.partialorder %v678_v56, 8.507059e+37 }
 0x1b9   :  { %v677_v8 = vsel %vm676_vm3, %v1003_v50, %v673_v4  ;;  %v745_v47 = vadd.f32 %v744_v52, %v743_v54  ;;  %v780_v10 = vrot.slane %v1738_v39, 2  ;;  %v753_v36 = vadd.f32 %v752_v48, %v1503_v43  ;;  %v1015_v43 = vld [vmem:[%s1781_s0 + $0x78] sm:$0xff]  ;;  %s1042_s0 = smov [#allocation2]  }
 0x1ba   :  { %v682_v27 = vsel %vm679_vm5, %v681_v22, %v677_v8  ;;  %v765_v14 = vadd.f32 %v764_v33, %v763_v46  ;;  %v775_v13 = vadd.f32 %v774_v55, %v1482_v21  ;;  %v821_v59 = vsel %vm820_vm4, %v735_v17, %v819_v24  ;;  %s841_s25 = sshll.u32 %s1042_s0, 4  ;;  %s842_s25 = int_to_ptr.vmem [resolvable:$true] %s841_s25 }
 0x1bb   :  { %v683_v45 = vmul.f32 %v1679_v7, %v682_v27  ;;  %v746_v32 = vrot.slane %v745_v47, 1  ;;  %vm822_vm6 = vcmask 1046534   ;;  %v741_v34 = vadd.f32 %v740_v49, %v739_v58 }
 0x1bc   :  { %v771_v44 = vadd.f32 %v770_v37, %v769_v63  ;;  %v787_v30 = vadd.f32 %v786_v16, %v785_v57  ;;  %vm824_vm7 = vcmask 1047559   ;;  %v781_v2 = vadd.f32 %v780_v10, %v1738_v39 }
 0x1bd   :  { %v699_v48 = vmul.f32 %v1015_v43, %v683_v45  ;;  %v747_v31 = vadd.f32 %v746_v32, %v745_v47  ;;  %v826_v21 = vsel %vm812_vm13, %v1740_v20, %v753_v36  ;;  %v776_v55 = vrot.slane %v775_v13, 1 }
 0x1be   :  { %v823_v7 = vsel %vm822_vm6, %v741_v34, %v821_v59  ;;  %v827_v12 = vsel %vm814_vm14, %v765_v14, %v826_v21  ;;  %v788_v41 = vrot.slane %v787_v30, 1  ;;  %v782_v38 = vrot.slane %v781_v2, 1 }
 0x1bf   :  { %v790_v1 = vrot.slane %v699_v48, 4  ;;  %v825_v19 = vsel %vm824_vm7, %v747_v31, %v823_v7  ;;  %v828_v51 = vsel %vm816_vm15, %v771_v44, %v827_v12  ;;  %v777_v62 = vadd.f32 %v776_v55, %v775_v13 }
 0x1c0   :  { %835 = vst [vmem:[#allocation2] sm:$0xff] %v825_v19  ;;  %v789_v39 = vadd.f32 %v788_v41, %v787_v30  ;;  %v783_v20 = vadd.f32 %v782_v38, %v781_v2 }
 0x1c1   :  { %v791_v28 = vadd.f32 %v790_v1, %v699_v48  ;;  %v829_v3 = vsel %vm818_vm0, %v777_v62, %v828_v51 }
 0x1c2   :  { %v830_v26 = vsel %vm820_vm4, %v783_v20, %v829_v3 }
 0x1c3   :  { %v792_v11 = vrot.slane %v791_v28, 2  ;;  %v831_v42 = vsel %vm822_vm6, %v789_v39, %v830_v26 }
 0x1c5   :  { %v793_v25 = vadd.f32 %v792_v11, %v791_v28 }
 0x1c7   :  { %v794_v50 = vrot.slane %v793_v25, 1 }
 0x1c9   :  { %v795_v23 = vadd.f32 %v794_v50, %v793_v25 }
 0x1cb   :  { %v832_v0 = vsel %vm824_vm7, %v795_v23, %v831_v42 }
 0x1cc   :  { %836 = vst [vmem:[#allocation2 + $0x8] sm:$0xff] %v832_v0 }
 0x1cd   :  { %849 = dma.vmem_to_hbm [thread:$0]  %s842_s25, 256, %s844_s27, [#allocation3], %s1043_s28, %s1043_s28, %s1044_s2  }
 0x1ce   :  { %1040 = dma.done.wait [#allocation3], 256  }
 0x1cf   :  { %1041 = vsyncadd [#allocation3], 4294967040 }
 0x1d0   :  { %854 = vsyncpa [#allocation3], 1 }

</bundles_post_ra>
